<compile_context>
chip_gen: v5e
topology: v5e:2x2
jax: 0.10.0
libtpu: 0.0.40
codegen_flags: <defaults>
</compile_context>

<pallas_src>
import math
import functools

import jax
import jax.numpy as jnp
from jax import lax
from jax.experimental import pallas as pl
from jax.experimental.pallas import tpu as pltpu


# ------------------------------ tiling helpers ------------------------------ #

def _pick_tile(dim, target, align):
    """Largest divisor of `dim` that is <= target and a multiple of `align`.
    Falls back to the full dim (a full-extent block is always legal)."""
    if dim <= target:
        return dim
    if dim % align:
        return dim
    t = target - (target % align)
    while t >= align:
        if dim % t == 0:
            return t
        t -= align
    return dim


def _vmem_limit_bytes(tile_bytes):
    # Double-buffered pipeline over all operands plus headroom, clamped to
    # [32 MiB, 64 MiB] (64 MiB == v7x physical VMEM per TensorCore).
    need = 4 * tile_bytes
    return int(max(32 * 1024 * 1024, min(64 * 1024 * 1024, need)))


# ------------------------------ tiled matmul -------------------------------- #

def _matmul_kernel(x_ref, w_ref, o_ref, acc_ref, *, mxu_bf16):
    @pl.when(pl.program_id(2) == 0)
    def _():
        acc_ref[...] = jnp.zeros_like(acc_ref)

    x = x_ref[...]
    w = w_ref[...]
    if mxu_bf16:
        x = x.astype(jnp.bfloat16)
        w = w.astype(jnp.bfloat16)
    acc_ref[...] += jnp.dot(x, w, preferred_element_type=jnp.float32)

    @pl.when(pl.program_id(2) == pl.num_programs(2) - 1)
    def _():
        o_ref[...] = acc_ref[...].astype(o_ref.dtype)


def pallas_matmul(x, w, *, block_m=256, block_n=512, block_k=512, mxu_bf16=False):
    """x: (M, K), w: (K, N) -> (M, N), tiled + pipelined with f32 accumulation."""
    M, K = x.shape
    K2, N = w.shape
    assert K == K2

    tm = _pick_tile(M, block_m, 8)
    tn = _pick_tile(N, block_n, 128)
    tk = _pick_tile(K, block_k, 128)
    grid = (M // tm, N // tn, K // tk)

    itemsize = x.dtype.itemsize
    limit = _vmem_limit_bytes((tm * tk + tk * tn + tm * tn) * itemsize + tm * tn * 4)

    kern = functools.partial(_matmul_kernel, mxu_bf16=mxu_bf16)
    return pl.pallas_call(
        kern,
        out_shape=jax.ShapeDtypeStruct((M, N), x.dtype),
        grid=grid,
        in_specs=[
            pl.BlockSpec((tm, tk), lambda i, j, k: (i, k)),
            pl.BlockSpec((tk, tn), lambda i, j, k: (k, j)),
        ],
        out_specs=pl.BlockSpec((tm, tn), lambda i, j, k: (i, j)),
        scratch_shapes=[pltpu.VMEM((tm, tn), jnp.float32)],
        compiler_params=pltpu.CompilerParams(
            dimension_semantics=("parallel", "parallel", "arbitrary"),
            vmem_limit_bytes=limit,
        ),
        cost_estimate=pl.CostEstimate(
            flops=2 * M * N * K,
            transcendentals=0,
            bytes_accessed=(M * K + K * N + M * N) * itemsize,
        ),
    )(x, w)


# ----------------------- causal flash attention kernel ---------------------- #

def _flash_attn_kernel(q_ref, k_ref, v_ref, o_ref, m_ref, l_ref, acc_ref, *,
                       scale, block_q, block_k, mxu_bf16):
    qi = pl.program_id(2)
    ki = pl.program_id(3)

    @pl.when(ki == 0)
    def _():
        m_ref[...] = jnp.full_like(m_ref, -jnp.inf)
        l_ref[...] = jnp.zeros_like(l_ref)
        acc_ref[...] = jnp.zeros_like(acc_ref)

    # Causal: this KV block contributes iff its first key index is <= the last
    # query index of this query block. Skipping halves MXU work for causal.
    @pl.when(ki * block_k <= qi * block_q + (block_q - 1))
    def _():
        # Fold the softmax scale into q (T*D multiplies instead of T*T).
        q = q_ref[...].astype(jnp.float32) * scale
        k = k_ref[...]
        v = v_ref[...]
        if mxu_bf16:
            q = q.astype(jnp.bfloat16)
            k = k.astype(jnp.bfloat16)
        # Contract on the last dims directly: no XLU transpose of K.
        s = lax.dot_general(q, k, (((1,), (1,)), ((), ())),
                            preferred_element_type=jnp.float32)  # (tq, tk)

        q_pos = qi * block_q + lax.broadcasted_iota(jnp.int32, (block_q, block_k), 0)
        k_pos = ki * block_k + lax.broadcasted_iota(jnp.int32, (block_q, block_k), 1)
        s = jnp.where(k_pos <= q_pos, s, -jnp.inf)

        m_prev = m_ref[...]
        m_new = jnp.maximum(m_prev, jnp.max(s, axis=-1, keepdims=True))
        alpha = jnp.exp(m_prev - m_new)
        p = jnp.exp(s - m_new)

        l_ref[...] = alpha * l_ref[...] + jnp.sum(p, axis=-1, keepdims=True)
        pv_dtype = jnp.bfloat16 if mxu_bf16 else jnp.float32
        pv = jnp.dot(p.astype(pv_dtype), v.astype(pv_dtype),
                     preferred_element_type=jnp.float32)          # (tq, D)
        acc_ref[...] = alpha * acc_ref[...] + pv
        m_ref[...] = m_new

    @pl.when(ki == pl.num_programs(3) - 1)
    def _():
        inv_l = pl.reciprocal(l_ref[...], approx=True)            # EUP, ~free
        o_ref[...] = (acc_ref[...] * inv_l).astype(o_ref.dtype)


def pallas_flash_attention(q, k, v, scale, *, block_q=256, block_k=256,
                           mxu_bf16=False):
    """q, k, v: (B, H, T, D) -> (B, H, T, D), causal online-softmax attention."""
    B, H, T, D = q.shape
    bq = _pick_tile(T, block_q, 8)
    bk = _pick_tile(T, block_k, 8)
    grid = (B, H, T // bq, T // bk)

    # TODO(synk): D < 128 leaves lane-sparse output stores; folding heads into
    # the minor dim would make stores lane-dense at the cost of in-kernel
    # relayout.  Kept per-head layout (standard TPU flash-attention layout).
    q_spec = pl.BlockSpec((None, None, bq, D), lambda b, h, qi, ki: (b, h, qi, 0))
    kv_spec = pl.BlockSpec((None, None, bk, D), lambda b, h, qi, ki: (b, h, ki, 0))
    o_spec = pl.BlockSpec((None, None, bq, D), lambda b, h, qi, ki: (b, h, qi, 0))

    itemsize = q.dtype.itemsize
    limit = _vmem_limit_bytes((2 * bq * D + 2 * bk * D) * itemsize
                              + (bq * (D + 2)) * 4)

    kern = functools.partial(_flash_attn_kernel, scale=scale,
                             block_q=bq, block_k=bk, mxu_bf16=mxu_bf16)
    return pl.pallas_call(
        kern,
        out_shape=jax.ShapeDtypeStruct((B, H, T, D), q.dtype),
        grid=grid,
        in_specs=[q_spec, kv_spec, kv_spec],
        out_specs=o_spec,
        scratch_shapes=[
            pltpu.VMEM((bq, 1), jnp.float32),   # running max m
            pltpu.VMEM((bq, 1), jnp.float32),   # running denom l
            pltpu.VMEM((bq, D), jnp.float32),   # output accumulator
        ],
        compiler_params=pltpu.CompilerParams(
            dimension_semantics=("parallel", "parallel", "parallel", "arbitrary"),
            vmem_limit_bytes=limit,
        ),
        cost_estimate=pl.CostEstimate(
            flops=4 * B * H * T * T * D,
            transcendentals=B * H * T * T,
            bytes_accessed=4 * B * H * T * D * itemsize,
        ),
    )(q, k, v)


# ------------------------------ Module wrapper ------------------------------ #

class MultiHeadAttentionPallas:
    """Mirrors the PyTorch MultiHeadAttention forward pass exactly."""

    def __init__(self, n_embed, n_head, key, mxu_bf16=False):
        assert n_embed % n_head == 0
        self.n_embed = n_embed
        self.n_head = n_head
        self.head_size = n_embed // n_head
        self.mxu_bf16 = mxu_bf16          # set True on v6e/v7x for MXU bf16
        k1, k2 = jax.random.split(key)
        # nn.Linear(n_embed, 3*n_embed, bias=False) -> stored as (in, out)
        self.w_qkv = (jax.random.normal(k1, (n_embed, 3 * n_embed), jnp.float32)
                      * 0.02)
        # nn.Linear(n_embed, n_embed, bias=False) -> stored as (in, out)
        self.w_out = (jax.random.normal(k2, (n_embed, n_embed), jnp.float32)
                      * 0.02)

    def __call__(self, x, attention_mask=None):
        B, T, C = x.shape
        H, D = self.n_head, self.head_size

        # qkv projection (tiled Pallas matmul)
        qkv = pallas_matmul(x.reshape(B * T, C), self.w_qkv,
                            mxu_bf16=self.mxu_bf16)               # (B*T, 3C)

        # Reproduce the reference module's packing exactly (including its
        # unusual permute-before-flatten ordering):
        #   view(B,T,3,H,D).permute(0,2,1,3,4).reshape(B*T,3,H,D)
        qkv = qkv.reshape(B, T, 3, H, D)
        qkv = jnp.transpose(qkv, (0, 2, 1, 3, 4)).reshape(B * T, 3, H, D)

        # flash_attn_unpadded_qkvpacked_func semantics: the B*T token axis is
        # split into B sequences of length T, causal within each.  Unpack to
        # (3, B, H, T, D) with a single transpose.
        qkv = jnp.transpose(qkv.reshape(B, T, 3, H, D), (2, 0, 3, 1, 4))
        q, k, v = qkv[0], qkv[1], qkv[2]                          # (B, H, T, D)

        # softmax_scale=None -> 1/sqrt(head_size)
        scale = 1.0 / math.sqrt(D)
        # TODO(synk): dropout_p=config.DROPOUT is ignored (eval/deterministic).
        attn = pallas_flash_attention(q, k, v, scale,
                                      mxu_bf16=self.mxu_bf16)     # (B, H, T, D)

        # Reference: view(B,T,H,D).permute(0,2,1,3).reshape(B,C,T).permute(0,2,1)
        # `attn` is already in the permuted (B,H,T,D) layout, so fold directly
        # (removes two redundant transposes of the previous version).
        y = jnp.transpose(attn.reshape(B, C, T), (0, 2, 1))       # (B, T, C)

        # output projection (tiled Pallas matmul)
        out = pallas_matmul(y.reshape(B * T, C), self.w_out,
                            mxu_bf16=self.mxu_bf16)
        return out.reshape(B, T, C)


# ----------------------------- pure-JAX reference ---------------------------- #

def _reference_forward(mod, x):
    B, T, C = x.shape
    H, D = mod.n_head, mod.head_size
    qkv = x.reshape(B * T, C) @ mod.w_qkv
    qkv = qkv.reshape(B, T, 3, H, D)
    qkv = jnp.transpose(qkv, (0, 2, 1, 3, 4)).reshape(B * T, 3, H, D)
    q = jnp.transpose(qkv[:, 0].reshape(B, T, H, D), (0, 2, 1, 3))
    k = jnp.transpose(qkv[:, 1].reshape(B, T, H, D), (0, 2, 1, 3))
    v = jnp.transpose(qkv[:, 2].reshape(B, T, H, D), (0, 2, 1, 3))
    s = jnp.einsum("bhqd,bhkd->bhqk", q, k) / math.sqrt(D)
    mask = jnp.tril(jnp.ones((T, T), bool))
    s = jnp.where(mask, s, -jnp.inf)
    p = jax.nn.softmax(s, axis=-1)
    o = jnp.einsum("bhqk,bhkd->bhqd", p, v)                       # (B, H, T, D)
    y = jnp.transpose(o.reshape(B, C, T), (0, 2, 1))
    return (y.reshape(B * T, C) @ mod.w_out).reshape(B, T, C)


# ---------------------------------- main ------------------------------------ #

if __name__ == "__main__":
    key = jax.random.PRNGKey(0)
    k_param, k_x = jax.random.split(key)

    n_embed, n_head = 32, 4
    B, T = 2, 8

    module = MultiHeadAttentionPallas(n_embed, n_head, k_param)
    x = jax.random.normal(k_x, (B, T, n_embed), jnp.float32)

    out = module(x)
    out = jax.block_until_ready(out)
    assert out.shape == (B, T, n_embed)
    assert out.dtype == jnp.float32

    ref = _reference_forward(module, x)
    assert jnp.allclose(out, ref, rtol=5e-2, atol=5e-3), "mismatch vs reference"

    print("KERNEL_OK")
</pallas_src>

<mosaic_0001>
module attributes {stable_mosaic.version = 11 : i64} {
  func.func @_matmul_kernel(%arg0: i32, %arg1: i32, %arg2: i32, %arg3: memref<16x32xf32, #tpu.memory_space<vmem>>, %arg4: memref<32x96xf32, #tpu.memory_space<vmem>>, %arg5: memref<16x96xf32, #tpu.memory_space<vmem>>, %arg6: memref<16x96xf32, #tpu.memory_space<vmem>>) attributes {dimension_semantics = [#tpu.dimension_semantics<parallel>, #tpu.dimension_semantics<parallel>, #tpu.dimension_semantics<arbitrary>], iteration_bounds = array<i64: 1, 1, 1>, scalar_prefetch = 0 : i64, scratch_operands = 1 : i64, tpu.core_type = #tpu.core_type<tc>, window_params = [{transform_indices = @transform_0, window_bounds = array<i64: 16, 32>}, {transform_indices = @transform_1, window_bounds = array<i64: 32, 96>}, {transform_indices = @transform_2, window_bounds = array<i64: 16, 96>}]} {
    %c0_i32 = arith.constant 0 : i32
    %0 = arith.cmpi eq, %arg2, %c0_i32 : i32
    %1 = arith.extui %0 : i1 to i32
    %c0_i32_0 = arith.constant 0 : i32
    %2 = arith.cmpi ne, %1, %c0_i32_0 : i32
    scf.if %2 {
      %cst_10 = arith.constant 0.000000e+00 : f32
      %12 = vector.broadcast %cst_10 : f32 to vector<16x96xf32>
      %c0_11 = arith.constant 0 : index
      %c0_12 = arith.constant 0 : index
      %13 = vector.load %arg6[%c0_11, %c0_12] : memref<16x96xf32, #tpu.memory_space<vmem>>, vector<16x96xf32>
      tpu.vector_store %arg6[%c0_11, %c0_12], %12 {strides = array<i32>} : memref<16x96xf32, #tpu.memory_space<vmem>>, vector<16x96xf32>,
    } else {
    }
    %c0 = arith.constant 0 : index
    %c0_1 = arith.constant 0 : index
    %3 = vector.load %arg3[%c0, %c0_1] : memref<16x32xf32, #tpu.memory_space<vmem>>, vector<16x32xf32>
    %c0_2 = arith.constant 0 : index
    %c0_3 = arith.constant 0 : index
    %4 = vector.load %arg4[%c0_2, %c0_3] : memref<32x96xf32, #tpu.memory_space<vmem>>, vector<32x96xf32>
    %c0_4 = arith.constant 0 : index
    %c0_5 = arith.constant 0 : index
    %5 = vector.load %arg6[%c0_4, %c0_5] : memref<16x96xf32, #tpu.memory_space<vmem>>, vector<16x96xf32>
    %cst = arith.constant dense<0.000000e+00> : vector<16x96xf32>
    %6 = tpu.matmul %3, %4, %cst {dimension_numbers = #tpu.dot_dimension_numbers<[1], [0], [0], [1], [0, 0, 1, 1], [], []>} : vector<16x32xf32>, vector<32x96xf32>, vector<16x96xf32> -> vector<16x96xf32>
    %7 = arith.addf %5, %6 : vector<16x96xf32>
    %c0_6 = arith.constant 0 : index
    %c0_7 = arith.constant 0 : index
    %8 = vector.load %arg6[%c0_6, %c0_7] : memref<16x96xf32, #tpu.memory_space<vmem>>, vector<16x96xf32>
    tpu.vector_store %arg6[%c0_6, %c0_7], %7 {strides = array<i32>} : memref<16x96xf32, #tpu.memory_space<vmem>>, vector<16x96xf32>,
    %c0_i32_8 = arith.constant 0 : i32
    %9 = arith.cmpi eq, %arg2, %c0_i32_8 : i32
    %10 = arith.extui %9 : i1 to i32
    %c0_i32_9 = arith.constant 0 : i32
    %11 = arith.cmpi ne, %10, %c0_i32_9 : i32
    scf.if %11 {
      %c0_10 = arith.constant 0 : index
      %c0_11 = arith.constant 0 : index
      %12 = vector.load %arg6[%c0_10, %c0_11] : memref<16x96xf32, #tpu.memory_space<vmem>>, vector<16x96xf32>
      %c0_12 = arith.constant 0 : index
      %c0_13 = arith.constant 0 : index
      %13 = vector.load %arg5[%c0_12, %c0_13] : memref<16x96xf32, #tpu.memory_space<vmem>>, vector<16x96xf32>
      tpu.vector_store %arg5[%c0_12, %c0_13], %12 {strides = array<i32>} : memref<16x96xf32, #tpu.memory_space<vmem>>, vector<16x96xf32>,
    } else {
    }
    return
  }
  func.func @transform_0(%arg0: i32, %arg1: i32, %arg2: i32) -> (i32, i32) {
    %c0_i32 = arith.constant 0 : i32
    return %arg0, %arg2 : i32, i32
  }
  func.func @transform_1(%arg0: i32, %arg1: i32, %arg2: i32) -> (i32, i32) {
    %c0_i32 = arith.constant 0 : i32
    return %arg2, %arg1 : i32, i32
  }
  func.func @transform_2(%arg0: i32, %arg1: i32, %arg2: i32) -> (i32, i32) {
    %c0_i32 = arith.constant 0 : i32
    return %arg0, %arg1 : i32, i32
  }
}

</mosaic_0001>

<bundles_post_ra>
// kernel: tpu_custom_call.1
= control target key start
LH: loop header
LB: loop body
LE: loop exit
PB: predicated region body
PF: predicated region fallthrough
CT: control target
= control target key end

     0   :  { %7 = vsyncpa [#allocation4], 0  ;;  %s256_s0 = inlined_call_operand.hbm [shape: f32[16,32], index: 0, kind: input, shape index: {}]   ;;  %s257_s1 = inlined_call_operand.hbm [shape: f32[32,96], index: 1, kind: input, shape index: {}]   ;;  %s258_s2 = inlined_call_operand.hbm [shape: f32[16,96], index: 2, kind: output, shape index: {}]  }
   0x1   :  { %8 = vsyncpa [#allocation7], 0 }
   0x2   :  { %9 = vsyncpa [#allocation5], 0  ;;  %s14_s11 = sshll.u32 %s256_s0, 4  ;;  %s211_s12 = smov [#allocation3]   ;;  %s15_s11 = int_to_ptr.hbm [resolvable:$true] %s14_s11 }
   0x3   :  { %s16_s13 = sshll.u32 %s211_s12, 4  ;;  %s27_s16 = sshll.u32 %s257_s1, 4  ;;  %s17_s13 = int_to_ptr.vmem [resolvable:$true] %s16_s13  ;;  %s28_s16 = int_to_ptr.hbm [resolvable:$true] %s27_s16 }
   0x4   :  { %s212_s17 = smov 128   ;;  %s213_s18 = smov 8  }
   0x5   :  { %22 = dma.hbm_to_vmem [thread:$0]  %s15_s11, 256, %s17_s13, [#allocation4], %s212_s17, %s212_s17, %s213_s18  }
   0x6   :  { %s214_s19 = smov [#allocation6]  }
   0x7   :  { %s29_s20 = sshll.u32 %s214_s19, 4  ;;  %s30_s20 = int_to_ptr.vmem [resolvable:$true] %s29_s20 }
   0x8   :  { %35 = dma.hbm_to_vmem [thread:$0]  %s28_s16, 512, %s30_s20, [#allocation7], %s212_s17, %s212_s17, %s213_s18  }
   0x9   :  { %205 = dma.done.wait [#allocation4], 256  }
   0xa   :  { %206 = vsyncadd [#allocation4], 4294967040 }
   0xb   :  { %207 = dma.done.wait [#allocation7], 512  }
   0xc   :  { %208 = vsyncadd [#allocation7], 4294966784  ;;  %vm48_vm0 = vcmask 785408   ;;  %v215_v0 = vmov 0.0   ;;  %v56_v1 = vld [vmem:[#allocation6 + $0x18] sm:$0xff]  ;;  %v55_v2 = vld [vmem:[#allocation6 + $0x10] sm:$0xff] }
   0xd   :  { %49 = vst.msk [vmem:[#allocation2] sm:$0xff] %vm48_vm0, %v215_v0  ;;  %78 = vmatpush.msra.mxu0 %v56_v1  ;;  %123 = vmatpush.msra.mxu1 %v56_v1  ;;  %v54_v3 = vld [vmem:[#allocation6 + $0x8] sm:$0xff]  ;;  %v53_v4 = vld [vmem:[#allocation6] sm:$0xff]  ;;  %v51_v5 = vld [vmem:[#allocation3] sm:$0xff]  ;;  %vm59_vm1 = vcmask 261120   ;;  %s216_s0 = smov [#allocation8]  }
   0xe   :  { %50 = vst.msk [vmem:[#allocation2 + $0x8] sm:$0xff] %vm48_vm0, %v215_v0  ;;  %v52_v6 = vld [vmem:[#allocation3 + $0x8] sm:$0xff]  ;;  %s105_s1 = sshll.u32 %s216_s0, 4  ;;  %s107_s23 = sshll.u32 %s258_s2, 4  ;;  %s106_s1 = int_to_ptr.vmem [resolvable:$true] %s105_s1  ;;  %s108_s23 = int_to_ptr.hbm [resolvable:$true] %s107_s23 }
   0xf   :  { %79 = vmatpush.msra.mxu0 %v55_v2  ;;  %124 = vmatpush.msra.mxu1 %v55_v2 }
  0x11   :  { %80 = vmatpush.msra.mxu0 %v54_v3  ;;  %125 = vmatpush.msra.mxu1 %v54_v3 }
  0x13   :  { %81 = vmatpush.msra.mxu0 %v53_v4  ;;  %126 = vmatpush.msra.mxu1 %v53_v4 }
  0x14   :  { %121 = vmatmul.msk.f32.vlgmr.msra.gmra.mxu0 %vm59_vm1, %v51_v5  ;;  %122 = vmatmul.msk.f32.vlgmr.msra.gmra.mxu1 %vm59_vm1, %v52_v6  ;;  %v57_v7 = vld [vmem:[#allocation2] sm:$0xff] }
  0x15   :  { %v58_v8 = vld [vmem:[#allocation2 + $0x8] sm:$0xff] }
  0x91   :  { %v83_v9 = vpop.f32.mrf.mxu0  ;;  %v86_v10 = vpop.f32.mrf.mxu1 }
  0x92   :  { %v89_v11 = vadd.f32 %v83_v9, %v57_v7  ;;  %v90_v12 = vadd.f32 %v86_v10, %v58_v8 }
  0x94   :  { %92 = vst.msk [vmem:[#allocation2] sm:$0xff] %vm48_vm0, %v89_v11 }
  0x95   :  { %93 = vst.msk [vmem:[#allocation2 + $0x8] sm:$0xff] %vm48_vm0, %v90_v12 }
  0x9b   :  { %v97_v13 = vld [vmem:[#allocation2] sm:$0xff] }
  0x9c   :  { %v98_v14 = vld [vmem:[#allocation2 + $0x8] sm:$0xff]  ;;  %99 = vst.msk [vmem:[#allocation8] sm:$0xff] %vm48_vm0, %v97_v13 }
  0x9d   :  { %100 = vst.msk [vmem:[#allocation8 + $0x8] sm:$0xff] %vm48_vm0, %v98_v14 }
  0x9e   :  { %113 = dma.vmem_to_hbm [thread:$0]  %s106_s1, 256, %s108_s23, [#allocation5], %s212_s17, %s212_s17, %s213_s18  }
  0x9f   :  { %209 = dma.done.wait [#allocation5], 256  }
  0xa0   :  { %210 = vsyncadd [#allocation5], 4294967040 }
  0xa1   :  { %118 = vsyncpa [#allocation4], 1 }
  0xa2   :  { %119 = vsyncpa [#allocation7], 1 }
  0xa3   :  { %120 = vsyncpa [#allocation5], 1 }

</bundles_post_ra>
